<compile_context>
chip_gen: v7x
topology: tpu7x:2x2x1
jax: 0.10.0
libtpu: 0.0.40
codegen_flags: <defaults>
</compile_context>

<pallas_src>
import functools

import jax
import jax.numpy as jnp
from jax import lax
from jax.experimental import pallas as pl
from jax.experimental.pallas import tpu as pltpu


def _round_up(x, m):
    return ((x + m - 1) // m) * m


def _linear_kernel(x_ref, w_ref, b_ref, o_ref, acc_ref):
    # x_ref: (tm, tk)   w_ref: (tn, tk)  (PyTorch (out, in) layout, tiled)
    # b_ref: (1, tn) f32   o_ref: (tm, tn)   acc_ref: (tm, tn) f32 scratch
    k = pl.program_id(2)

    @pl.when(k == 0)
    def _():
        acc_ref[...] = jnp.zeros_like(acc_ref)

    # Contract last dim of x with last dim of w -> (tm, tn); avoids needing a
    # transposed copy of the weight in HBM.
    acc_ref[...] += lax.dot_general(
        x_ref[...], w_ref[...],
        dimension_numbers=(((1,), (1,)), ((), ())),
        preferred_element_type=jnp.float32)

    @pl.when(k == pl.num_programs(2) - 1)
    def _():
        o_ref[...] = (acc_ref[...] + b_ref[...]).astype(o_ref.dtype)


@functools.partial(jax.jit, static_argnames=("tm", "tn", "tk"))
def linear_norm_pallas(x, weight, bias, *, tm=256, tn=256, tk=512):
    """y = x @ weight.T + bias, matching torch.nn.Linear semantics.

    x:      (..., in_dim)
    weight: (out_dim, in_dim)   (PyTorch layout, used as-is)
    bias:   (out_dim,)
    returns (..., out_dim)
    """
    in_dim = x.shape[-1]
    out_dim = weight.shape[0]
    lead_shape = x.shape[:-1]

    x2d = x.reshape(-1, in_dim)
    M = x2d.shape[0]

    # Sublane granularity: 16 rows for 2-byte dtypes (bf16), 8 for f32.
    sub = 16 if x.dtype.itemsize == 2 else 8

    # Clamp tile sizes so tiny problems don't over-pad, keeping alignment:
    # tm multiple of sublane count, tn/tk multiples of 128 lanes.
    tm = min(tm, _round_up(M, sub))
    tn = min(tn, _round_up(out_dim, 128))
    tk = min(tk, _round_up(in_dim, 128))

    M_pad = _round_up(M, tm)
    N_pad = _round_up(out_dim, tn)
    K_pad = _round_up(in_dim, tk)

    # Zero-pad: padded K columns contribute 0 to the dot; padded N columns are
    # sliced off below.
    if (M_pad, K_pad) != (M, in_dim):
        x2d = jnp.pad(x2d, ((0, M_pad - M), (0, K_pad - in_dim)))
    w = weight
    if (N_pad, K_pad) != (out_dim, in_dim):
        w = jnp.pad(w, ((0, N_pad - out_dim), (0, K_pad - in_dim)))
    b_row = jnp.pad(bias.astype(jnp.float32),
                    (0, N_pad - out_dim)).reshape(1, N_pad)

    grid = (M_pad // tm, N_pad // tn, K_pad // tk)

    itemsize = x.dtype.itemsize
    cost = pl.CostEstimate(
        flops=2 * M_pad * K_pad * N_pad,
        transcendentals=0,
        bytes_accessed=(x2d.size * itemsize
                        + w.size * w.dtype.itemsize
                        + b_row.size * 4
                        + M_pad * N_pad * itemsize))

    # Double-buffered input/output tiles + f32 accumulator + bias row.
    vmem_est = (2 * (tm * tk + tn * tk + tm * tn) * itemsize
                + 2 * tn * 4
                + tm * tn * 4)
    vmem_limit = int(min(max(2 * vmem_est, 32 * 1024 * 1024),
                         48 * 1024 * 1024))

    out = pl.pallas_call(
        _linear_kernel,
        out_shape=jax.ShapeDtypeStruct((M_pad, N_pad), x.dtype),
        grid_spec=pltpu.PrefetchScalarGridSpec(
            num_scalar_prefetch=0,
            grid=grid,
            in_specs=[
                pl.BlockSpec((tm, tk), lambda i, j, k: (i, k)),
                pl.BlockSpec((tn, tk), lambda i, j, k: (j, k)),
                pl.BlockSpec((1, tn), lambda i, j, k: (0, j)),
            ],
            out_specs=pl.BlockSpec((tm, tn), lambda i, j, k: (i, j)),
            scratch_shapes=[pltpu.VMEM((tm, tn), jnp.float32)],
        ),
        compiler_params=pltpu.CompilerParams(
            dimension_semantics=("parallel", "parallel", "arbitrary"),
            vmem_limit_bytes=vmem_limit,
        ),
        cost_estimate=cost,
    )(x2d, w, b_row)

    out = out[:M, :out_dim]
    return out.reshape(*lead_shape, out_dim)


def init_linear_norm_params(key, in_dim, out_dim, w_init_gain="linear",
                            dtype=jnp.float32):
    """Deterministic xavier_uniform init matching the PyTorch module."""
    gain = 1.0  # calculate_gain('linear') == 1.0
    limit = gain * (6.0 / (in_dim + out_dim)) ** 0.5
    wkey, _ = jax.random.split(key)
    weight = jax.random.uniform(
        wkey, (out_dim, in_dim), dtype=dtype, minval=-limit, maxval=limit)
    # torch.nn.Linear default bias init is U(-1/sqrt(in_dim), 1/sqrt(in_dim));
    # zeros kept here for determinism of the synthetic check.
    bias = jnp.zeros((out_dim,), dtype=dtype)
    return weight, bias


if __name__ == "__main__":
    key = jax.random.PRNGKey(0)
    k_x, k_p = jax.random.split(key)

    batch, seq, in_dim, out_dim = 2, 8, 32, 64
    x = jax.random.normal(k_x, (batch, seq, in_dim), dtype=jnp.float32)

    weight, bias = init_linear_norm_params(k_p, in_dim, out_dim,
                                           w_init_gain="linear")

    y = linear_norm_pallas(x, weight, bias)
    y = jax.block_until_ready(y)

    # Reference check against plain JAX (same semantics as torch.nn.Linear).
    y_ref = x @ weight.T + bias
    assert y.shape == (batch, seq, out_dim)
    assert jnp.allclose(y, y_ref, atol=1e-5, rtol=1e-5)

    print("KERNEL_OK")
</pallas_src>

<mosaic_0001>
module attributes {stable_mosaic.version = 11 : i64} {
  func.func @_linear_kernel(%arg0: i32, %arg1: i32, %arg2: i32, %arg3: memref<16x128xf32, #tpu.memory_space<vmem>>, %arg4: memref<128x128xf32, #tpu.memory_space<vmem>>, %arg5: memref<1x128xf32, #tpu.memory_space<vmem>>, %arg6: memref<16x128xf32, #tpu.memory_space<vmem>>, %arg7: memref<16x128xf32, #tpu.memory_space<vmem>>) attributes {dimension_semantics = [#tpu.dimension_semantics<parallel>, #tpu.dimension_semantics<parallel>, #tpu.dimension_semantics<arbitrary>], iteration_bounds = array<i64: 1, 1, 1>, scalar_prefetch = 0 : i64, scratch_operands = 1 : i64, tpu.core_type = #tpu.core_type<tc>, window_params = [{transform_indices = @transform_0, window_bounds = array<i64: 16, 128>}, {transform_indices = @transform_1, window_bounds = array<i64: 128, 128>}, {transform_indices = @transform_2, window_bounds = array<i64: 1, 128>}, {transform_indices = @transform_3, window_bounds = array<i64: 16, 128>}]} {
    %c0_i32 = arith.constant 0 : i32
    %0 = arith.cmpi eq, %arg2, %c0_i32 : i32
    %1 = arith.extui %0 : i1 to i32
    %c0_i32_0 = arith.constant 0 : i32
    %2 = arith.cmpi ne, %1, %c0_i32_0 : i32
    scf.if %2 {
      %cst_10 = arith.constant 0.000000e+00 : f32
      %12 = vector.broadcast %cst_10 : f32 to vector<16x128xf32>
      %c0_11 = arith.constant 0 : index
      %c0_12 = arith.constant 0 : index
      %13 = vector.load %arg7[%c0_11, %c0_12] : memref<16x128xf32, #tpu.memory_space<vmem>>, vector<16x128xf32>
      tpu.vector_store %arg7[%c0_11, %c0_12], %12 {strides = array<i32>} : memref<16x128xf32, #tpu.memory_space<vmem>>, vector<16x128xf32>,
    } else {
    }
    %c0 = arith.constant 0 : index
    %c0_1 = arith.constant 0 : index
    %3 = vector.load %arg7[%c0, %c0_1] : memref<16x128xf32, #tpu.memory_space<vmem>>, vector<16x128xf32>
    %c0_2 = arith.constant 0 : index
    %c0_3 = arith.constant 0 : index
    %4 = vector.load %arg3[%c0_2, %c0_3] : memref<16x128xf32, #tpu.memory_space<vmem>>, vector<16x128xf32>
    %c0_4 = arith.constant 0 : index
    %c0_5 = arith.constant 0 : index
    %5 = vector.load %arg4[%c0_4, %c0_5] : memref<128x128xf32, #tpu.memory_space<vmem>>, vector<128x128xf32>
    %cst = arith.constant dense<0.000000e+00> : vector<16x128xf32>
    %6 = tpu.matmul %4, %5, %cst {dimension_numbers = #tpu.dot_dimension_numbers<[1], [1], [0], [0], [0, 0, 1, 0], [], []>} : vector<16x128xf32>, vector<128x128xf32>, vector<16x128xf32> -> vector<16x128xf32>
    %7 = arith.addf %3, %6 : vector<16x128xf32>
    %c0_6 = arith.constant 0 : index
    %c0_7 = arith.constant 0 : index
    %8 = vector.load %arg7[%c0_6, %c0_7] : memref<16x128xf32, #tpu.memory_space<vmem>>, vector<16x128xf32>
    tpu.vector_store %arg7[%c0_6, %c0_7], %7 {strides = array<i32>} : memref<16x128xf32, #tpu.memory_space<vmem>>, vector<16x128xf32>,
    %c0_i32_8 = arith.constant 0 : i32
    %9 = arith.cmpi eq, %arg2, %c0_i32_8 : i32
    %10 = arith.extui %9 : i1 to i32
    %c0_i32_9 = arith.constant 0 : i32
    %11 = arith.cmpi ne, %10, %c0_i32_9 : i32
    scf.if %11 {
      %c0_10 = arith.constant 0 : index
      %c0_11 = arith.constant 0 : index
      %12 = vector.load %arg7[%c0_10, %c0_11] : memref<16x128xf32, #tpu.memory_space<vmem>>, vector<16x128xf32>
      %c0_12 = arith.constant 0 : index
      %c0_13 = arith.constant 0 : index
      %13 = vector.load %arg5[%c0_12, %c0_13] : memref<1x128xf32, #tpu.memory_space<vmem>>, vector<1x128xf32>
      %14 = vector.broadcast %13 : vector<1x128xf32> to vector<16x128xf32>
      %15 = arith.addf %12, %14 : vector<16x128xf32>
      %c0_14 = arith.constant 0 : index
      %c0_15 = arith.constant 0 : index
      %16 = vector.load %arg6[%c0_14, %c0_15] : memref<16x128xf32, #tpu.memory_space<vmem>>, vector<16x128xf32>
      tpu.vector_store %arg6[%c0_14, %c0_15], %15 {strides = array<i32>} : memref<16x128xf32, #tpu.memory_space<vmem>>, vector<16x128xf32>,
    } else {
    }
    return
  }
  func.func @transform_0(%arg0: i32, %arg1: i32, %arg2: i32) -> (i32, i32) {
    %c0_i32 = arith.constant 0 : i32
    return %arg0, %arg2 : i32, i32
  }
  func.func @transform_1(%arg0: i32, %arg1: i32, %arg2: i32) -> (i32, i32) {
    %c0_i32 = arith.constant 0 : i32
    return %arg1, %arg2 : i32, i32
  }
  func.func @transform_2(%arg0: i32, %arg1: i32, %arg2: i32) -> (i32, i32) {
    %c0_i32 = arith.constant 0 : i32
    %c0_i32_0 = arith.constant 0 : i32
    return %c0_i32, %arg1 : i32, i32
  }
  func.func @transform_3(%arg0: i32, %arg1: i32, %arg2: i32) -> (i32, i32) {
    %c0_i32 = arith.constant 0 : i32
    return %arg0, %arg1 : i32, i32
  }
}

</mosaic_0001>

<bundles_post_ra>
// kernel: linear_norm_pallas.1
= control target key start
LH: loop header
LB: loop body
LE: loop exit
PB: predicated region body
PF: predicated region fallthrough
CT: control target
= control target key end

     0   :  { %s308_s1 = inlined_call_operand.vmem [shape: f32[128,128], index: 1, kind: input, shape index: {}]   ;;  %s309_s0 = inlined_call_operand.vmem [shape: f32[16,128], index: 0, kind: input, shape index: {}]   ;;  %s310_s2 = inlined_call_operand.vmem [shape: f32[1,128], index: 2, kind: input, shape index: {}]   ;;  %s311_s3 = inlined_call_operand.vmem [shape: f32[16,128], index: 3, kind: output, shape index: {}]  }
   0x1   :  { %v24_v0 = vld [vmem:[%s308_s1] sm:$0xff]  ;;  %v25_v1 = vld [vmem:[%s308_s1 + $0x8] sm:$0xff]  ;;  %v26_v2 = vld [vmem:[%s308_s1 + $0x10] sm:$0xff] }
   0x2   :  { %v193_v3 = vpack.c.bf16 %v25_v1, %v24_v0  ;;  %v27_v4 = vld [vmem:[%s308_s1 + $0x18] sm:$0xff]  ;;  %v22_v6 = vld [vmem:[%s309_s0] sm:$0xff]  ;;  %v29_v8 = vld [vmem:[%s308_s1 + $0x28] sm:$0xff] }
   0x3   :  { %v197_v5 = vpack.c.bf16 %v27_v4, %v26_v2  ;;  %v28_v7 = vld [vmem:[%s308_s1 + $0x20] sm:$0xff]  ;;  %190 = vmatprep.mubr.f32.mxu0 %v22_v6  ;;  %v30_v10 = vld [vmem:[%s308_s1 + $0x30] sm:$0xff]  ;;  %v31_v11 = vld [vmem:[%s308_s1 + $0x38] sm:$0xff] }
   0x4   :  { %194 = vmatprep.subr.bf16.mxu0 %v193_v3  ;;  %v201_v9 = vpack.c.bf16 %v29_v8, %v28_v7  ;;  %v205_v12 = vpack.c.bf16 %v31_v11, %v30_v10  ;;  %v32_v13 = vld [vmem:[%s308_s1 + $0x40] sm:$0xff]  ;;  %v33_v14 = vld [vmem:[%s308_s1 + $0x48] sm:$0xff]  ;;  %v34_v16 = vld [vmem:[%s308_s1 + $0x50] sm:$0xff] }
   0x5   :  { %196 = vmatpush3.bf16.xpose.msra.mxu0 %v193_v3  ;;  %v209_v15 = vpack.c.bf16 %v33_v14, %v32_v13  ;;  %v35_v17 = vld [vmem:[%s308_s1 + $0x58] sm:$0xff]  ;;  %v36_v19 = vld [vmem:[%s308_s1 + $0x60] sm:$0xff]  ;;  %v37_v20 = vld [vmem:[%s308_s1 + $0x68] sm:$0xff] }
   0x6   :  { %198 = vmatprep.subr.bf16.mxu0 %v197_v5  ;;  %v213_v18 = vpack.c.bf16 %v35_v17, %v34_v16  ;;  %v217_v21 = vpack.c.bf16 %v37_v20, %v36_v19  ;;  %v38_v22 = vld [vmem:[%s308_s1 + $0x70] sm:$0xff]  ;;  %v39_v23 = vld [vmem:[%s308_s1 + $0x78] sm:$0xff]  ;;  %v23_v25 = vld [vmem:[%s309_s0 + $0x8] sm:$0xff] }
   0x7   :  { %v221_v24 = vpack.c.bf16 %v39_v23, %v38_v22  ;;  %v139_v26 = vld [vmem:[%s310_s2] ss:$0 sm:$0xff] }
   0xd   :  { %200 = vmatpush3.bf16.xpose.msra.mxu0 %v197_v5 }
   0xe   :  { %202 = vmatprep.subr.bf16.mxu0 %v201_v9 }
  0x15   :  { %204 = vmatpush3.bf16.xpose.msra.mxu0 %v201_v9 }
  0x16   :  { %206 = vmatprep.subr.bf16.mxu0 %v205_v12 }
  0x1d   :  { %208 = vmatpush3.bf16.xpose.msra.mxu0 %v205_v12 }
  0x1e   :  { %210 = vmatprep.subr.bf16.mxu0 %v209_v15 }
  0x25   :  { %212 = vmatpush3.bf16.xpose.msra.mxu0 %v209_v15 }
  0x26   :  { %214 = vmatprep.subr.bf16.mxu0 %v213_v18 }
  0x2d   :  { %216 = vmatpush3.bf16.xpose.msra.mxu0 %v213_v18 }
  0x2e   :  { %218 = vmatprep.subr.bf16.mxu0 %v217_v21 }
  0x35   :  { %220 = vmatpush3.bf16.xpose.msra.mxu0 %v217_v21 }
  0x36   :  { %222 = vmatprep.subr.bf16.mxu0 %v221_v24 }
  0x3d   :  { %224 = vmatpush3.bf16.xpose.msra.mxu0 %v221_v24 }
  0x44   :  { %191 = vmatmul.mubr.f32.vlgmr.msra.gmra.mrb[0].mxu0 %v23_v25 }
 0x117   :  { %v192_v27 = vpop.f32.mrb[0].mxu0 }
 0x118   :  { %v132_v28 = vadd.f32 %v192_v27, %v139_v26  ;;  %v106_v29 = vpop.f32.mrb[1].mxu0 }
 0x119   :  { %v131_v30 = vadd.f32 %v139_v26, %v106_v29 }
 0x11a   :  { %134 = vst [vmem:[%s311_s3 + $0x8] sm:$0xff] %v132_v28 }
 0x11b   :  { %133 = vst [vmem:[%s311_s3] sm:$0xff] %v131_v30 }

</bundles_post_ra>
